<compile_context>
chip_gen: v7x
topology: tpu7x:2x2x1
jax: 0.10.0
libtpu: 0.0.40
codegen_flags: <defaults>
</compile_context>

<pallas_src>
import functools

import jax
import jax.numpy as jnp
from jax.experimental import pallas as pl
from jax.experimental.pallas import tpu as pltpu


_COEF_COLS = 8  # [1, row_idx, col_idx, 0, 0, 0, 0, 0]


def _softargmax2d_kernel(x_ref, coef_ref, red_ref, *, beta):
    """Fused softmax numerator + index-weighted reductions for one BN tile.

    x_ref:    (T, H*W) tile of flattened heatmaps (HBM dtype, upcast here)
    coef_ref: (H*W, 8) constant matrix [1, row_idx, col_idx, 0...]
    red_ref:  (T, 8)   col0 = sum(e), col1 = sum(e*row), col2 = sum(e*col)
    """
    x = x_ref[...].astype(jnp.float32)                    # (T, HW)
    m = jnp.max(x, axis=1, keepdims=True)                 # (T, 1) stable shift
    e = jnp.exp((x - m) * beta)                           # (T, HW)  EUP

    # One small MXU matmul does all cross-lane reductions + index weighting.
    # precision=HIGHEST keeps the sums at ~f32 accuracy; MXU headroom at N=8
    # makes this free in a DMA/EUP-bound kernel.
    red_ref[...] = jnp.dot(
        e, coef_ref[...],
        preferred_element_type=jnp.float32,
        precision=jax.lax.Precision.HIGHEST)


def _tpu_tuning():
    """Return (target_block_bytes, vmem_limit_bytes); safe for any generation."""
    tile_bytes, vmem_limit = 4 << 20, 32 << 20            # safe fallback
    try:
        info = pltpu.get_tpu_info()
        vmem = getattr(info, "vmem_capacity_bytes", None)
        if vmem is not None:
            if vmem >= (100 << 20):                        # v5e / v6e: 128 MiB VMEM
                tile_bytes, vmem_limit = 8 << 20, 64 << 20
            else:                                          # v7x: 64 MiB per TC
                tile_bytes, vmem_limit = 2 << 20, 32 << 20
    except Exception:
        pass
    return tile_bytes, vmem_limit


def soft_argmax_2d(heatmap, *, beta=100, return_xy=True,
                   target_block_bytes=None, vmem_limit_bytes=None):
    """heatmap: (B, N, H, W) float array -> (B, N, 2)."""
    if beta < 0.0:
        raise ValueError(f"Invalid beta: {beta}")
    b, n, h, w = heatmap.shape
    bn = b * n
    hw = h * w

    # Fast path: bf16 heatmaps are consumed in bf16 from HBM (half the DMA
    # bytes) and upcast to f32 inside the kernel.
    x = heatmap.reshape(bn, hw)
    itemsize = jnp.dtype(x.dtype).itemsize
    row_bytes = hw * itemsize

    auto_tile, auto_vmem = _tpu_tuning()
    if target_block_bytes is None:
        target_block_bytes = auto_tile
    if vmem_limit_bytes is None:
        vmem_limit_bytes = auto_vmem

    # --- Tile selection along the fused BN axis ---------------------------
    bn_rounded = ((bn + 7) // 8) * 8
    t = max(8, (int(target_block_bytes) // row_bytes) // 8 * 8)
    # Keep >= 2 balanced grid steps for non-tiny problems so the "parallel"
    # grid axis can shard across v7x's two TensorCores.
    if bn * row_bytes > (1 << 20):
        half = ((pl.cdiv(bn, 2) + 7) // 8) * 8
        t = min(t, half)
    t = int(min(t, bn_rounded))
    grid = pl.cdiv(bn, t)
    # No padding: last block may be partial; OOB rows only produce garbage in
    # output rows whose stores are masked (rows are fully independent).

    # --- Constant reduction matrix (HW, 8): [1, row_idx, col_idx, 0...] ----
    k = jnp.arange(hw, dtype=jnp.int32)
    ones = jnp.ones((hw, 1), jnp.float32)
    rr = (k // w).astype(jnp.float32)[:, None]
    cc = (k % w).astype(jnp.float32)[:, None]
    pad = jnp.zeros((hw, _COEF_COLS - 3), jnp.float32)
    coef = jnp.concatenate([ones, rr, cc, pad], axis=1)    # (HW, 8)

    kernel = functools.partial(_softargmax2d_kernel, beta=float(beta))

    red = pl.pallas_call(
        kernel,
        out_shape=jax.ShapeDtypeStruct((bn, _COEF_COLS), jnp.float32),
        grid_spec=pltpu.PrefetchScalarGridSpec(
            num_scalar_prefetch=0,
            grid=(grid,),
            in_specs=[
                pl.BlockSpec((t, hw), lambda i: (i, 0)),            # heatmap tile
                pl.BlockSpec((hw, _COEF_COLS), lambda i: (0, 0)),   # constant coef
            ],
            out_specs=pl.BlockSpec((t, _COEF_COLS), lambda i: (i, 0)),
        ),
        compiler_params=pltpu.CompilerParams(
            dimension_semantics=("parallel",),
            vmem_limit_bytes=int(vmem_limit_bytes),
        ),
    )(x, coef)

    # Tiny (BN, 8) epilogue in the wrapper: exact divide + column select +
    # optional xy swap (keeps narrow-lane slices/concat out of the kernel).
    denom = red[:, 0:1]
    approx_r = red[:, 1:2] / denom          # expected row (y)
    approx_c = red[:, 2:3] / denom          # expected col (x)
    parts = [approx_c, approx_r] if return_xy else [approx_r, approx_c]
    return jnp.concatenate(parts, axis=1).reshape(b, n, 2)


def _reference_soft_argmax_2d(heatmap, beta=100, return_xy=True):
    """Pure-JAX reference mirroring the PyTorch module."""
    b, n, h, w = heatmap.shape
    hm = heatmap.astype(jnp.float32) * beta
    sm = jax.nn.softmax(hm.reshape(b, n, h * w), axis=2).reshape(b, n, h, w)
    rr, cc = jnp.meshgrid(jnp.arange(h), jnp.arange(w), indexing="ij")
    approx_r = jnp.sum(sm * rr.astype(jnp.float32), axis=(2, 3))[..., None]
    approx_c = jnp.sum(sm * cc.astype(jnp.float32), axis=(2, 3))[..., None]
    parts = [approx_c, approx_r] if return_xy else [approx_r, approx_c]
    return jnp.concatenate(parts, axis=2)


if __name__ == "__main__":
    key = jax.random.PRNGKey(0)
    B, N, H, W = 2, 4, 16, 16
    heatmap = jax.random.normal(key, (B, N, H, W), dtype=jnp.float32)

    out = jax.block_until_ready(soft_argmax_2d(heatmap, beta=100, return_xy=True))
    ref = _reference_soft_argmax_2d(heatmap, beta=100, return_xy=True)
    assert out.shape == (B, N, 2), out.shape
    assert jnp.allclose(out, ref, atol=1e-3, rtol=1e-3), (out, ref)

    # return_xy=False and a BN that is not a multiple of the sublane tile
    # (exercises the partial last block path — no wrapper-side padding copy).
    out_yx = jax.block_until_ready(
        soft_argmax_2d(heatmap[:, :3], beta=100, return_xy=False))
    ref_yx = _reference_soft_argmax_2d(heatmap[:, :3], beta=100, return_xy=False)
    assert out_yx.shape == (B, 3, 2), out_yx.shape
    assert jnp.allclose(out_yx, ref_yx, atol=1e-3, rtol=1e-3), (out_yx, ref_yx)

    # bf16 fast path: heatmap stays bf16 in HBM, kernel upcasts internally.
    hm_bf16 = heatmap.astype(jnp.bfloat16)
    out_bf16 = jax.block_until_ready(
        soft_argmax_2d(hm_bf16, beta=100, return_xy=True))
    ref_bf16 = _reference_soft_argmax_2d(hm_bf16, beta=100, return_xy=True)
    assert jnp.allclose(out_bf16, ref_bf16, atol=1e-3, rtol=1e-3), (out_bf16, ref_bf16)

    print("KERNEL_OK")
</pallas_src>

<mosaic_0001>
module attributes {stable_mosaic.version = 11 : i64} {
  func.func @_softargmax2d_kernel(%arg0: i32, %arg1: memref<8x256xf32, #tpu.memory_space<vmem>>, %arg2: memref<256x8xf32, #tpu.memory_space<vmem>>, %arg3: memref<8x8xf32, #tpu.memory_space<vmem>>) attributes {dimension_semantics = [#tpu.dimension_semantics<parallel>], iteration_bounds = array<i64: 1>, scalar_prefetch = 0 : i64, scratch_operands = 0 : i64, tpu.core_type = #tpu.core_type<tc>, window_params = [{transform_indices = @transform_0, window_bounds = array<i64: 8, 256>}, {pipeline_mode = #tpu.pipeline_mode<synchronous>, transform_indices = @transform_1, window_bounds = array<i64: 256, 8>}, {transform_indices = @transform_2, window_bounds = array<i64: 8, 8>}]} {
    %c0 = arith.constant 0 : index
    %c0_0 = arith.constant 0 : index
    %0 = vector.load %arg1[%c0, %c0_0] : memref<8x256xf32, #tpu.memory_space<vmem>>, vector<8x256xf32>
    %cst = arith.constant dense<0xFF800000> : vector<8xf32>
    %1 = vector.multi_reduction <maximumf>, %0, %cst [1] : vector<8x256xf32> to vector<8xf32>
    %2 = vector.shape_cast %1 : vector<8xf32> to vector<8x1xf32>
    %3 = vector.broadcast %2 : vector<8x1xf32> to vector<8x256xf32>
    %4 = arith.subf %0, %3 : vector<8x256xf32>
    %cst_1 = arith.constant 1.000000e+02 : f32
    %5 = vector.broadcast %cst_1 : f32 to vector<8x256xf32>
    %6 = arith.mulf %4, %5 : vector<8x256xf32>
    %7 = math.exp %6 : vector<8x256xf32>
    %c0_2 = arith.constant 0 : index
    %c0_3 = arith.constant 0 : index
    %8 = vector.load %arg2[%c0_2, %c0_3] : memref<256x8xf32, #tpu.memory_space<vmem>>, vector<256x8xf32>
    %cst_4 = arith.constant dense<0.000000e+00> : vector<8x8xf32>
    %9 = tpu.matmul %7, %8, %cst_4 {dimension_numbers = #tpu.dot_dimension_numbers<[1], [0], [0], [1], [0, 0, 1, 1], [], []>, precision = #tpu.contract_precision<fp32>} : vector<8x256xf32>, vector<256x8xf32>, vector<8x8xf32> -> vector<8x8xf32>
    %c0_5 = arith.constant 0 : index
    %c0_6 = arith.constant 0 : index
    %10 = vector.load %arg3[%c0_5, %c0_6] : memref<8x8xf32, #tpu.memory_space<vmem>>, vector<8x8xf32>
    tpu.vector_store %arg3[%c0_5, %c0_6], %9 {strides = array<i32>} : memref<8x8xf32, #tpu.memory_space<vmem>>, vector<8x8xf32>,
    return
  }
  func.func @transform_0(%arg0: i32) -> (i32, i32) {
    %c0_i32 = arith.constant 0 : i32
    %c0_i32_0 = arith.constant 0 : i32
    return %arg0, %c0_i32 : i32, i32
  }
  func.func @transform_1(%arg0: i32) -> (i32, i32) {
    %c0_i32 = arith.constant 0 : i32
    %c0_i32_0 = arith.constant 0 : i32
    %c0_i32_1 = arith.constant 0 : i32
    return %c0_i32, %c0_i32_0 : i32, i32
  }
  func.func @transform_2(%arg0: i32) -> (i32, i32) {
    %c0_i32 = arith.constant 0 : i32
    %c0_i32_0 = arith.constant 0 : i32
    return %arg0, %c0_i32 : i32, i32
  }
}

</mosaic_0001>

<bundles_post_ra>
// kernel: tpu_custom_call.1
= control target key start
LH: loop header
LB: loop body
LE: loop exit
PB: predicated region body
PF: predicated region fallthrough
CT: control target
= control target key end

     0   :  { %s2010_s0 = inlined_call_operand.vmem [shape: f32[8,256], index: 0, kind: input, shape index: {}]   ;;  %s2011_s1 = inlined_call_operand.vmem [shape: f32[256,8], index: 1, kind: input, shape index: {}]   ;;  %s2012_s2 = inlined_call_operand.hbm [shape: f32[8,8], index: 2, kind: output, shape index: {}]  }
   0x1   :  { %v1385_v0 = vld [vmem:[%s2010_s0] sm:$0xff]  ;;  %v1390_v1 = vld [vmem:[%s2010_s0 + $0x8] sm:$0xff]  ;;  %v1409_v11 = vld [vmem:[%s2011_s1 + $0x90] sm:$0xff] }
   0x2   :  { %v41_v2 = vld [vmem:[%s2011_s1 + $0x80] sm:$0xff]  ;;  %v14_v3 = vmax.f32 %v1385_v0, %v1390_v1  ;;  %v42_v4 = vld [vmem:[%s2011_s1 + $0x88] sm:$0xff]  ;;  %v1414_v12 = vld [vmem:[%s2011_s1 + $0x98] sm:$0xff]  ;;  %v112_v15 = vand.u32 4294901760, %v1409_v11 }
   0x3   :  { %v106_v5 = vand.u32 4294901760, %v41_v2  ;;  %v25_v6 = vld [vmem:[%s2011_s1] sm:$0xff]  ;;  %v26_v7 = vld [vmem:[%s2011_s1 + $0x8] sm:$0xff]  ;;  %v109_v8 = vand.u32 4294901760, %v42_v4  ;;  %v1419_v13 = vld [vmem:[%s2011_s1 + $0x10] sm:$0xff]  ;;  %v115_v16 = vand.u32 4294901760, %v1414_v12 }
   0x4   :  { %v58_v9 = vand.u32 4294901760, %v25_v6  ;;  %v61_v10 = vand.u32 4294901760, %v26_v7  ;;  %15 = vmax.xlane.f32.xlu0 %v14_v3  ;;  %v1428_v17 = vld [vmem:[%s2011_s1 + $0x18] sm:$0xff]  ;;  %v64_v18 = vand.u32 4294901760, %v1419_v13  ;;  %v1440_v24 = vsub.f32 %v1409_v11, %v112_v15 }
   0x5   :  { %v1421_v14 = vsub.f32 %v41_v2, %v106_v5  ;;  %v1431_v19 = vsub.f32 %v42_v4, %v109_v8  ;;  %v67_v22 = vand.u32 4294901760, %v1428_v17  ;;  %v1443_v25 = vsub.f32 %v1414_v12, %v115_v16 }
   0x6   :  { %v1433_v20 = vsub.f32 %v25_v6, %v58_v9  ;;  %v1435_v21 = vsub.f32 %v26_v7, %v61_v10  ;;  %v1448_v26 = vsub.f32 %v1419_v13, %v64_v18 }
   0x7   :  { %v2028_v23 = vand.u32 4294901760, %v1421_v14  ;;  %v2027_v27 = vand.u32 4294901760, %v1431_v19  ;;  %v1454_v30 = vsub.f32 %v1428_v17, %v67_v22 }
   0x8   :  { %v2026_v28 = vand.u32 4294901760, %v1433_v20  ;;  %v2025_v29 = vand.u32 4294901760, %v1435_v21 }
   0x9   :  { %7 = vsyncpa [#allocation3], 0  ;;  %v285_v31 = vsub.f32 %v1421_v14, %v2028_v23  ;;  %v2024_v32 = vand.u32 4294901760, %v1440_v24  ;;  %v2023_v33 = vand.u32 4294901760, %v1443_v25  ;;  %v2022_v34 = vand.u32 4294901760, %v1448_v26  ;;  %v1484_v43 = vld [vmem:[%s2011_s1 + $0xa0] sm:$0xff] }
   0xa   :  { %v292_v35 = vsub.f32 %v1431_v19, %v2027_v27  ;;  %v173_v36 = vsub.f32 %v1433_v20, %v2026_v28  ;;  %v180_v37 = vsub.f32 %v1435_v21, %v2025_v29  ;;  %v2021_v38 = vand.u32 4294901760, %v1454_v30  ;;  %v1492_v48 = vld [vmem:[%s2011_s1 + $0xa8] sm:$0xff]  ;;  %v1497_v49 = vld [vmem:[%s2011_s1 + $0x20] sm:$0xff]  ;;  %v1509_v55 = vld [vmem:[%s2011_s1 + $0xb0] sm:$0xff] }
   0xb   :  { %v286_v39 = vand.u32 4294901760, %v285_v31  ;;  %v299_v40 = vsub.f32 %v1440_v24, %v2024_v32  ;;  %v306_v41 = vsub.f32 %v1443_v25, %v2023_v33  ;;  %v187_v42 = vsub.f32 %v1448_v26, %v2022_v34  ;;  %v1504_v54 = vld [vmem:[%s2011_s1 + $0x28] sm:$0xff]  ;;  %v1515_v60 = vld [vmem:[%s2011_s1 + $0xb8] sm:$0xff]  ;;  %v1530_v7 = vld [vmem:[%s2011_s1 + $0x30] sm:$0xff] }
   0xc   :  { %v293_v44 = vand.u32 4294901760, %v292_v35  ;;  %v174_v45 = vand.u32 4294901760, %v173_v36  ;;  %v181_v46 = vand.u32 4294901760, %v180_v37  ;;  %v194_v47 = vsub.f32 %v1454_v30, %v2021_v38  ;;  %v1545_v12 = vld [vmem:[%s2011_s1 + $0x38] sm:$0xff]  ;;  %v1716_v38 = vld [vmem:[%s2011_s1 + $0xe8] sm:$0xff] }
   0xd   :  { %v300_v50 = vand.u32 4294901760, %v299_v40  ;;  %v307_v51 = vand.u32 4294901760, %v306_v41  ;;  %v188_v52 = vand.u32 4294901760, %v187_v42  ;;  %v1499_v53 = vpack.c.bf16 %v109_v8, %v106_v5 }
   0xe   :  { %v1177_v56 = vpack.c.bf16 %v293_v44, %v286_v39  ;;  %v1179_v57 = vpack.c.bf16 %v181_v46, %v174_v45  ;;  %v195_v58 = vand.u32 4294901760, %v194_v47  ;;  %v118_v59 = vand.u32 4294901760, %v1484_v43 }
   0xf   :  { %v1181_v61 = vpack.c.bf16 %v307_v51, %v300_v50  ;;  %1146 = vmatprep.subr.bf16.mxu0 %v1499_v53  ;;  %v121_v62 = vand.u32 4294901760, %v1492_v48  ;;  %v1519_v63 = vpack.c.bf16 %v61_v10, %v58_v9  ;;  %v70_v2 = vand.u32 4294901760, %v1497_v49 }
  0x10   :  { %1178 = vmatprep.subr.bf16.mxu1 %v1177_v56  ;;  %v1183_v3 = vpack.c.bf16 %v195_v58, %v188_v52  ;;  %v1523_v4 = vsub.f32 %v1484_v43, %v118_v59  ;;  %v73_v5 = vand.u32 4294901760, %v1504_v54  ;;  %v124_v6 = vand.u32 4294901760, %v1509_v55  ;;  %v1605_v56 = vld [vmem:[%s2011_s1 + $0xc8] sm:$0xff] }
  0x11   :  { %1180 = vmatpush3.bf16.msra.mxu1 %v1179_v57  ;;  %v1533_v8 = vsub.f32 %v1492_v48, %v121_v62  ;;  %1148 = vmatpush3.bf16.msra.mxu0 %v1519_v63  ;;  %v1537_v9 = vsub.f32 %v1497_v49, %v70_v2  ;;  %v1539_v10 = vpack.c.bf16 %v115_v16, %v112_v15  ;;  %v127_v11 = vand.u32 4294901760, %v1515_v60  ;;  %v1596_v49 = vld [vmem:[%s2011_s1 + $0xc0] sm:$0xff] }
  0x12   :  { %1182 = vmatprep.subr.bf16.mxu1 %v1181_v61  ;;  %v2020_v17 = vand.u32 4294901760, %v1523_v4  ;;  %v1549_v31 = vsub.f32 %v1504_v54, %v73_v5  ;;  %v1554_v35 = vsub.f32 %v1509_v55, %v124_v6  ;;  %v1558_v15 = vpack.c.bf16 %v67_v22, %v64_v18  ;;  %v1668_v55 = vld [vmem:[%s2011_s1 + $0x58] sm:$0xff] }
  0x13   :  { %v2019_v16 = vand.u32 4294901760, %v1533_v8  ;;  %v2018_v36 = vand.u32 4294901760, %v1537_v9  ;;  %1150 = vmatprep.subr.bf16.mxu0 %v1539_v10  ;;  %v1564_v37 = vsub.f32 %v1515_v60, %v127_v11  ;;  %v76_v39 = vand.u32 4294901760, %v1530_v7 }
  0x14   :  { %v313_v40 = vsub.f32 %v1523_v4, %v2020_v17  ;;  %v2017_v41 = vand.u32 4294901760, %v1549_v31  ;;  %v2016_v13 = vand.u32 4294901760, %v1554_v35  ;;  %v79_v18 = vand.u32 4294901760, %v1545_v12 }
  0x15   :  { %1184 = vmatpush3.bf16.msra.mxu1 %v1183_v3  ;;  %v320_v22 = vsub.f32 %v1533_v8, %v2019_v16  ;;  %v201_v42 = vsub.f32 %v1537_v9, %v2018_v36  ;;  %v2015_v43 = vand.u32 4294901760, %v1564_v37  ;;  %1152 = vmatpush3.bf16.msra.mxu0 %v1558_v15  ;;  %v1582_v44 = vsub.f32 %v1530_v7, %v76_v39  ;;  %v1613_v3 = vld [vmem:[%s2011_s1 + $0x40] sm:$0xff] }
  0x16   :  { %v314_v45 = vand.u32 4294901760, %v313_v40  ;;  %v208_v46 = vsub.f32 %v1549_v31, %v2017_v41  ;;  %v327_v47 = vsub.f32 %v1554_v35, %v2016_v13  ;;  %v1591_v48 = vsub.f32 %v1545_v12, %v79_v18 }
  0x17   :  { %v321_v50 = vand.u32 4294901760, %v320_v22  ;;  %v202_v51 = vand.u32 4294901760, %v201_v42  ;;  %v334_v52 = vsub.f32 %v1564_v37, %v2015_v43  ;;  %v2014_v54 = vand.u32 4294901760, %v1582_v44  ;;  %v1622_v42 = vld [vmem:[%s2011_s1 + $0x48] sm:$0xff] }
  0x18   :  { %2056 = vst [vmem:[#allocation5_spill] sm:$0xff] %v1591_v48  ;;  %v209_v57 = vand.u32 4294901760, %v208_v46  ;;  %v328_v58 = vand.u32 4294901760, %v327_v47  ;;  %v2013_v60 = vand.u32 4294901760, %v1591_v48  ;;  %v1608_v61 = vpack.c.bf16 %v121_v62, %v118_v59  ;;  %v1634_v47 = vld [vmem:[%s2011_s1 + $0xd0] sm:$0xff] }
  0x19   :  { %v1185_v7 = vpack.c.bf16 %v321_v50, %v314_v45  ;;  %v335_v12 = vand.u32 4294901760, %v334_v52  ;;  %v215_v40 = vsub.f32 %v1582_v44, %v2014_v54  ;;  %v130_v22 = vand.u32 4294901760, %v1596_v49  ;;  %v1639_v50 = vld [vmem:[%s2011_s1 + $0xd8] sm:$0xff] }
  0x1a   :  { %v1187_v59 = vpack.c.bf16 %v209_v57, %v202_v51  ;;  %v222_v62 = vsub.f32 %v1591_v48, %v2013_v60  ;;  %1154 = vmatprep.subr.bf16.mxu0 %v1608_v61  ;;  %v133_v45 = vand.u32 4294901760, %v1605_v56  ;;  %v1629_v46 = vpack.c.bf16 %v73_v5, %v70_v2 }
  0x1b   :  { %1186 = vmatprep.subr.bf16.mxu1 %v1185_v7  ;;  %v1189_v51 = vpack.c.bf16 %v335_v12, %v328_v58  ;;  %v216_v52 = vand.u32 4294901760, %v215_v40  ;;  %v1642_v57 = vsub.f32 %v1596_v49, %v130_v22  ;;  %v82_v60 = vand.u32 4294901760, %v1613_v3 }
  0x1c   :  { %2057 = vst [vmem:[#allocation6_spill] sm:$0xff] %v1629_v46  ;;  %1188 = vmatpush3.bf16.msra.mxu1 %v1187_v59  ;;  %v223_v2 = vand.u32 4294901760, %v222_v62  ;;  %v1646_v5 = vsub.f32 %v1605_v56, %v133_v45  ;;  %1156 = vmatpush3.bf16.msra.mxu0 %v1629_v46  ;;  %v85_v54 = vand.u32 4294901760, %v1622_v42  ;;  %v1652_v43 = vpack.c.bf16 %v127_v11, %v124_v6  ;;  %v1663_v56 = vld [vmem:[%s2011_s1 + $0x50] sm:$0xff] }
  0x1d   :  { %1190 = vmatprep.subr.bf16.mxu1 %v1189_v51  ;;  %v2036_v58 = vand.u32 4294901760, %v1642_v57  ;;  %v1656_v49 = vsub.f32 %v1613_v3, %v82_v60  ;;  %v136_v7 = vand.u32 4294901760, %v1634_v47  ;;  %v139_v12 = vand.u32 4294901760, %v1639_v50 }
  0x1e   :  { %2058 = vst [vmem:[#allocation7_spill] sm:$0xff] %v1652_v43  ;;  %v1191_v6 = vpack.c.bf16 %v223_v2, %v216_v52  ;;  %v2035_v11 = vand.u32 4294901760, %v1646_v5  ;;  %v1672_v3 = vsub.f32 %v1622_v42, %v85_v54  ;;  %1158 = vmatprep.subr.bf16.mxu0 %v1652_v43  ;;  %v1675_v40 = vpack.c.bf16 %v79_v18, %v76_v39 }
  0x1f   :  { %v341_v59 = vsub.f32 %v1642_v57, %v2036_v58  ;;  %v2034_v62 = vand.u32 4294901760, %v1656_v49  ;;  %v1682_v51 = vsub.f32 %v1634_v47, %v136_v7  ;;  %v1685_v52 = vsub.f32 %v1639_v50, %v139_v12 }
  0x20   :  { %2059 = vst [vmem:[#allocation8_spill] sm:$0xff] %v1675_v40  ;;  %1192 = vmatpush3.bf16.msra.mxu1 %v1191_v6  ;;  %v348_v42 = vsub.f32 %v1646_v5, %v2035_v11  ;;  %v2031_v39 = vand.u32 4294901760, %v1672_v3  ;;  %1160 = vmatpush3.bf16.msra.mxu0 %v1675_v40  ;;  %v88_v18 = vand.u32 4294901760, %v1663_v56  ;;  %v91_v2 = vand.u32 4294901760, %v1668_v55 }
  0x21   :  { %v342_v13 = vand.u32 4294901760, %v341_v59  ;;  %v229_v47 = vsub.f32 %v1656_v49, %v2034_v62  ;;  %v2029_v50 = vand.u32 4294901760, %v1682_v51  ;;  %v2030_v6 = vand.u32 4294901760, %v1685_v52  ;;  %v1711_v59 = vld [vmem:[%s2011_s1 + $0xe0] sm:$0xff] }
  0x22   :  { %v349_v41 = vand.u32 4294901760, %v348_v42  ;;  %v236_v36 = vsub.f32 %v1672_v3, %v2031_v39  ;;  %v1703_v16 = vsub.f32 %v1663_v56, %v88_v18  ;;  %v1706_v17 = vsub.f32 %v1668_v55, %v91_v2 }
  0x23   :  { %v230_v42 = vand.u32 4294901760, %v229_v47  ;;  %v355_v34 = vsub.f32 %v1682_v51, %v2029_v50  ;;  %v362_v56 = vsub.f32 %v1685_v52, %v2030_v6  ;;  %v1724_v55 = vpack.c.bf16 %v133_v45, %v130_v22  ;;  %v1731_v47 = vld [vmem:[%s2011_s1 + $0x60] sm:$0xff] }
  0x24   :  { %v1193_v33 = vpack.c.bf16 %v349_v41, %v342_v13  ;;  %v237_v32 = vand.u32 4294901760, %v236_v36  ;;  %v2033_v29 = vand.u32 4294901760, %v1703_v16  ;;  %v2032_v28 = vand.u32 4294901760, %v1706_v17  ;;  %v38_v36 = vld [vmem:[%s2011_s1 + $0x68] sm:$0xff] }
  0x25   :  { %2060 = vst [vmem:[#allocation9_spill] sm:$0xff] %v1724_v55  ;;  %v356_v27 = vand.u32 4294901760, %v355_v34  ;;  %v363_v23 = vand.u32 4294901760, %v362_v56  ;;  %1162 = vmatprep.subr.bf16.mxu0 %v1724_v55  ;;  %v142_v50 = vand.u32 4294901760, %v1711_v59  ;;  %v145_v22 = vand.u32 4294901760, %v1716_v38  ;;  %v55_v56 = vld [vmem:[%s2011_s1 + $0xf0] sm:$0xff] }
  0x26   :  { %1194 = vmatprep.subr.bf16.mxu1 %v1193_v33  ;;  %v1195_v41 = vpack.c.bf16 %v237_v32, %v230_v42  ;;  %v243_v13 = vsub.f32 %v1703_v16, %v2033_v29  ;;  %v250_v34 = vsub.f32 %v1706_v17, %v2032_v28  ;;  %v1745_v45 = vpack.c.bf16 %v85_v54, %v82_v60  ;;  %v56_v42 = vld [vmem:[%s2011_s1 + $0xf8] sm:$0xff] }
  0x27   :  { %v1197_v6 = vpack.c.bf16 %v363_v23, %v356_v27  ;;  %v1751_v39 = vsub.f32 %v1711_v59, %v142_v50  ;;  %v1754_v32 = vsub.f32 %v1716_v38, %v145_v22  ;;  %v94_v33 = vand.u32 4294901760, %v1731_v47 }
  0x28   :  { %2061 = vst [vmem:[#allocation10_spill] sm:$0xff] %v1745_v45  ;;  %1196 = vmatpush3.bf16.msra.mxu1 %v1195_v41  ;;  %v244_v54 = vand.u32 4294901760, %v243_v13  ;;  %v251_v60 = vand.u32 4294901760, %v250_v34  ;;  %1164 = vmatpush3.bf16.msra.mxu0 %v1745_v45  ;;  %v97_v28 = vand.u32 4294901760, %v38_v36  ;;  %v1761_v29 = vpack.c.bf16 %v139_v12, %v136_v7  ;;  %v39_v41 = vld [vmem:[%s2011_s1 + $0x70] sm:$0xff]  ;;  %v40_v13 = vld [vmem:[%s2011_s1 + $0x78] sm:$0xff] }
  0x29   :  { %1198 = vmatprep.subr.bf16.mxu1 %v1197_v6  ;;  %v2039_v23 = vand.u32 4294901760, %v1751_v39  ;;  %v2040_v27 = vand.u32 4294901760, %v1754_v32  ;;  %v1766_v38 = vsub.f32 %v1731_v47, %v94_v33  ;;  %v148_v59 = vand.u32 4294901760, %v55_v56  ;;  %s1366_s1 = smov [#allocation2]  }
  0x2a   :  { %2062 = vst [vmem:[#allocation11_spill] sm:$0xff] %v1761_v29  ;;  %v1199_v34 = vpack.c.bf16 %v251_v60, %v244_v54  ;;  %v1774_v7 = vsub.f32 %v38_v36, %v97_v28  ;;  %1166 = vmatprep.subr.bf16.mxu0 %v1761_v29  ;;  %v151_v12 = vand.u32 4294901760, %v56_v42  ;;  %v1777_v6 = vpack.c.bf16 %v91_v2, %v88_v18  ;;  %s927_s19 = sshll.u32 %s1366_s1, 4  ;;  %s928_s19 = int_to_ptr.vmem [resolvable:$true] %s927_s19 }
  0x2b   :  { %v369_v47 = vsub.f32 %v1751_v39, %v2039_v23  ;;  %v376_v62 = vsub.f32 %v1754_v32, %v2040_v27  ;;  %v2049_v11 = vand.u32 4294901760, %v1766_v38  ;;  %v1786_v58 = vsub.f32 %v55_v56, %v148_v59  ;;  %s1342_s20 = scalar_lea.vmem %s928_s19, 128  ;;  %p1347_p1 = scmp.lt.s32.totalorder %s928_s19, %s928_s19 }
  0x2c   :  { %2063 = vst [vmem:[#allocation12_spill] sm:$0xff] %v1777_v6  ;;  %1200 = vmatpush3.bf16.msra.mxu1 %v1199_v34  ;;  %v2054_v36 = vand.u32 4294901760, %v1774_v7  ;;  %v1789_v54 = vsub.f32 %v56_v42, %v151_v12  ;;  %1168 = vmatpush3.bf16.msra.mxu0 %v1777_v6  ;;  %v100_v18 = vand.u32 4294901760, %v39_v41  ;;  %v103_v2 = vand.u32 4294901760, %v40_v13  ;;  %p1343_p0 = scmp.ne.s32.totalorder %s928_s19, %s1342_s20  ;;  %p1348_p2 = scmp.lt.s32.totalorder %s1342_s20, %s1342_s20 }
  0x2d   :  { %v370_v60 = vand.u32 4294901760, %v369_v47  ;;  %v377_v29 = vand.u32 4294901760, %v376_v62  ;;  %v257_v23 = vsub.f32 %v1766_v38, %v2049_v11  ;;  %v382_v27 = vand.u32 4294901760, %v1786_v58 }
  0x2e   :  { %v264_v56 = vsub.f32 %v1774_v7, %v2054_v36  ;;  %v389_v34 = vand.u32 4294901760, %v1789_v54  ;;  %v1800_v42 = vsub.f32 %v39_v41, %v100_v18  ;;  %v1802_v45 = vsub.f32 %v40_v13, %v103_v2  ;;  %p1349_p3 = por %p1348_p2, %p1347_p1 }
  0x2f   :  { %v1201_v6 = vpack.c.bf16 %v377_v29, %v370_v60  ;;  %v258_v55 = vand.u32 4294901760, %v257_v23  ;;  %v383_v62 = vsub.f32 %v1786_v58, %v382_v27  ;;  %v1805_v47 = vpack.c.bf16 %v145_v22, %v142_v50 }
  0x30   :  { %v265_v40 = vand.u32 4294901760, %v264_v56  ;;  %v390_v11 = vsub.f32 %v1789_v54, %v389_v34  ;;  %v270_v43 = vand.u32 4294901760, %v1800_v42  ;;  %v277_v46 = vand.u32 4294901760, %v1802_v45  ;;  %p1350_p4 = pnand %p1349_p3, %p1343_p0 }
  0x31   :  { %1202 = vmatprep.subr.bf16.mxu1 %v1201_v6  ;;  %v384_v36 = vand.u32 4294901760, %v383_v62  ;;  %1170 = vmatprep.subr.bf16.mxu0 %v1805_v47  ;;  %v1811_v41 = vpack.c.bf16 %v97_v28, %v94_v33  ;;  %v1813_v13 = vpack.c.bf16 %v151_v12, %v148_v59  ;;  %v1818_v60 = vpack.c.bf16 %v103_v2, %v100_v18 }
  0x32   :  { %v1203_v29 = vpack.c.bf16 %v265_v40, %v258_v55  ;;  %v391_v23 = vand.u32 4294901760, %v390_v11  ;;  %v271_v50 = vsub.f32 %v1800_v42, %v270_v43  ;;  %v278_v22 = vsub.f32 %v1802_v45, %v277_v46 }
  0x33   :  { %1172 = vmatpush3.bf16.msra.mxu0 %v1811_v41  ;;  %v1209_v33 = vpack.c.bf16 %v1431_v19, %v1421_v14  ;;  %v1217_v59 = vpack.c.bf16 %v1533_v8, %v1523_v4  ;;  %v1219_v18 = vpack.c.bf16 %v1549_v31, %v1537_v9  ;;  %v1223_v2 = vpack.c.bf16 %v1591_v48, %v1582_v44 }
  0x34   :  { %1204 = vmatpush3.bf16.msra.mxu1 %v1203_v29  ;;  %v1205_v40 = vpack.c.bf16 %v391_v23, %v384_v36  ;;  %v272_v11 = vand.u32 4294901760, %v271_v50  ;;  %v279_v55 = vand.u32 4294901760, %v278_v22  ;;  %1174 = vmatprep.subr.bf16.mxu0 %v1813_v13  ;;  %v1221_v36 = vpack.c.bf16 %v1564_v37, %v1554_v35 }
  0x35   :  { %v1225_v62 = vpack.c.bf16 %v1646_v5, %v1642_v57  ;;  %v1227_v29 = vpack.c.bf16 %v1672_v3, %v1656_v49  ;;  %v1229_v23 = vpack.c.bf16 %v1685_v52, %v1682_v51  ;;  %v2066_v50 = vand.u32 4294901760, %v1656_v49 }
  0x36   :  { %1206 = vmatprep.subr.bf16.mxu1 %v1205_v40  ;;  %v1207_v12 = vpack.c.bf16 %v279_v55, %v272_v11  ;;  %v2067_v56 = vand.u32 4294901760, %v1672_v3  ;;  %v2068_v40 = vand.u32 4294901760, %v1682_v51  ;;  %v2069_v6 = vand.u32 4294901760, %v1685_v52 }
  0x37   :  { %1176 = vmatpush3.bf16.msra.mxu0 %v1818_v60  ;;  %v2071_v55 = vand.u32 4294901760, %v1703_v16  ;;  %v2075_v49 = vand.u32 4294901760, %v1754_v32  ;;  %v2077_v3 = vand.u32 4294901760, %v1766_v38  ;;  %v2078_v51 = vand.u32 4294901760, %v1774_v7 }
  0x38   :  { %1208 = vmatpush3.bf16.msra.mxu1 %v1207_v12  ;;  %1210 = vmatprep.subr.bf16.mxu0 %v1209_v33  ;;  %v2064_v33 = vand.u32 4294901760, %v1642_v57  ;;  %v2065_v12 = vand.u32 4294901760, %v1646_v5  ;;  %v1865_v22 = vpack.c.bf16 %v2067_v56, %v2066_v50  ;;  %v1871_v11 = vpack.c.bf16 %v2069_v6, %v2068_v40 }
  0x39   :  { %1242 = vmatprep.subr.bf16.mxu1 %v1499_v53  ;;  %v2072_v57 = vand.u32 4294901760, %v1706_v17  ;;  %v2074_v5 = vand.u32 4294901760, %v1751_v39  ;;  %v1889_v56 = vpack.c.bf16 %v2078_v51, %v2077_v3  ;;  %v1891_v52 = vpack.c.bf16 %v389_v34, %v382_v27 }
  0x3a   :  { %v1859_v28 = vpack.c.bf16 %v2065_v12, %v2064_v33  ;;  %2070 = vst [vmem:[#allocation13_spill] sm:$0xff] %v1871_v11  ;;  %v1893_v6 = vpack.c.bf16 %v277_v46, %v270_v43  ;;  %vm919_vm0 = vcmask 64512  }
  0x3b   :  { %v1877_v48 = vpack.c.bf16 %v2072_v57, %v2071_v55  ;;  %v1883_v33 = vpack.c.bf16 %v2075_v49, %v2074_v5 }
  0x3d   :  { %2073 = vst [vmem:[#allocation14_spill] sm:$0xff] %v1877_v48  ;;  %2076 = vst [vmem:[#allocation15_spill] sm:$0xff] %v1883_v33 }
  0x91   :  { %v16_v50 = vpop.xlane.xlu0 %15 }
  0x92   :  { %v17_v40 = vsub.f32 %v1385_v0, %v16_v50  ;;  %v18_v55 = vsub.f32 %v1390_v1, %v16_v50  ;;  %v2080_v50 = vld [vmem:[#allocation6_spill] sm:$0xff] }
  0x94   :  { %v19_v12 = vmul.f32 100.0, %v17_v40  ;;  %v20_v57 = vmul.f32 100.0, %v18_v55  ;;  %v2081_v40 = vpack.c.bf16 %v1443_v25, %v1440_v24  ;;  %v2082_v55 = vld [vmem:[#allocation7_spill] sm:$0xff] }
  0x96   :  { %v21_v48 = vmul.f32 1.442695, %v19_v12  ;;  %v23_v5 = vmul.f32 1.442695, %v20_v57  ;;  %v2083_v12 = vpack.c.bf16 %v1454_v30, %v1448_v26  ;;  %v2084_v57 = vld [vmem:[#allocation8_spill] sm:$0xff] }
  0x98   :  { %1338 = vpow2.f32 %v21_v48 }
  0x99   :  { %1340 = vpow2.f32 %v23_v5  ;;  %v2085_v5 = vld [vmem:[#allocation9_spill] sm:$0xff] }
  0xa2   :  { %v1339_v49 = vpop.eup %1338 }
  0xa3   :  { %v1341_v33 = vpop.eup %1340  ;;  %v1897_v11 = vand.u32 4294901760, %v1339_v49 }
  0xa4   :  { %v153_v3 = vand.u32 4294901760, %v1341_v33 }
  0xa5   :  { %v160_v27 = vsub.f32 %v1339_v49, %v1897_v11  ;;  %v2086_v49 = vld [vmem:[#allocation10_spill] sm:$0xff] }
  0xa6   :  { %394 = vmatprep.mubr.f32.mxu1 %v153_v3  ;;  %v154_v43 = vsub.f32 %v1341_v33, %v153_v3  ;;  %v2079_v33 = vpack.c.bf16 %v1435_v21, %v1433_v20 }
  0xa7   :  { %396 = vmatmul.mubr.f32.vlgmr.msra.gmra.mrb[0].mxu1 %v1897_v11  ;;  %v161_v0 = vand.u32 4294901760, %v160_v27 }
  0xa8   :  { %1244 = vmatpush3.bf16.msra.mxu1 %v1519_v63  ;;  %v155_v1 = vand.u32 4294901760, %v154_v43 }
  0xa9   :  { %1246 = vmatprep.subr.bf16.mxu1 %v1539_v10  ;;  %v162_v46 = vsub.f32 %v160_v27, %v161_v0 }
  0xaa   :  { %638 = vmatprep.mubr.f32.mxu1 %v155_v1  ;;  %v156_v48 = vsub.f32 %v154_v43, %v155_v1  ;;  %v2088_v1 = vld [vmem:[#allocation12_spill] sm:$0xff] }
  0xab   :  { %v163_v34 = vand.u32 4294901760, %v162_v46 }
  0xac   :  { %1248 = vmatpush3.bf16.msra.mxu1 %v1558_v15  ;;  %v157_v51 = vand.u32 4294901760, %v156_v48 }
  0xad   :  { %1250 = vmatprep.subr.bf16.mxu1 %v1608_v61 }
  0xae   :  { %158 = vmatprep.mubr.f32.mxu0 %v157_v51 }
  0xaf   :  { %164 = vmatmul.mubr.f32.vlgmr.msra.gmra.mrb[0].mxu0 %v163_v34 }
  0xb0   :  { %1212 = vmatpush3.bf16.msra.mxu0 %v2079_v33  ;;  %1252 = vmatpush3.bf16.msra.mxu1 %v2080_v50 }
  0xb1   :  { %531 = vmatprep.mubr.f32.mxu0 %v154_v43  ;;  %1214 = vmatprep.subr.bf16.mxu0 %v2081_v40  ;;  %v2087_v43 = vld [vmem:[#allocation11_spill] sm:$0xff] }
  0xb2   :  { %1254 = vmatprep.subr.bf16.mxu1 %v2082_v55 }
  0xb4   :  { %1216 = vmatpush3.bf16.msra.mxu0 %v2083_v12  ;;  %1256 = vmatpush3.bf16.msra.mxu1 %v2084_v57 }
  0xb5   :  { %1218 = vmatprep.subr.bf16.mxu0 %v1217_v59  ;;  %1258 = vmatprep.subr.bf16.mxu1 %v2085_v5  ;;  %v2089_v59 = vpack.c.bf16 %v1706_v17, %v1703_v16  ;;  %v2092_v17 = vpack.c.bf16 %v1789_v54, %v1786_v58  ;;  %v2093_v16 = vand.u32 4294901760, %v1421_v14  ;;  %v2098_v14 = vand.u32 4294901760, %v1440_v24 }
  0xb6   :  { %v2104_v24 = vand.u32 4294901760, %v1537_v9  ;;  %v2111_v9 = vld [vmem:[#allocation13_spill] sm:$0xff] }
  0xb8   :  { %1220 = vmatpush3.bf16.msra.mxu0 %v1219_v18  ;;  %1260 = vmatpush3.bf16.msra.mxu1 %v2086_v49  ;;  %v2090_v18 = vpack.c.bf16 %v1754_v32, %v1751_v39  ;;  %v2097_v32 = vand.u32 4294901760, %v1435_v21  ;;  %v2103_v21 = vand.u32 4294901760, %v1533_v8  ;;  %v2109_v8 = vld [vmem:[#allocation5_spill] sm:$0xff] }
  0xb9   :  { %1222 = vmatprep.subr.bf16.mxu0 %v1221_v36  ;;  %1262 = vmatprep.subr.bf16.mxu1 %v2087_v43  ;;  %v2091_v36 = vpack.c.bf16 %v1774_v7, %v1766_v38 }
  0xbc   :  { %1224 = vmatpush3.bf16.msra.mxu0 %v1223_v2  ;;  %1264 = vmatpush3.bf16.msra.mxu1 %v2088_v1  ;;  %v2094_v2 = vand.u32 4294901760, %v1431_v19  ;;  %v2099_v19 = vand.u32 4294901760, %v1443_v25  ;;  %v2105_v25 = vand.u32 4294901760, %v1549_v31  ;;  %v2112_v31 = vld [vmem:[#allocation14_spill] sm:$0xff] }
  0xbd   :  { %1226 = vmatprep.subr.bf16.mxu0 %v1225_v62  ;;  %1266 = vmatprep.subr.bf16.mxu1 %v1805_v47 }
  0xbe   :  { %v1273_v39 = vpack.c.bf16 %v2094_v2, %v2093_v16  ;;  %v1277_v58 = vpack.c.bf16 %v2099_v19, %v2098_v14  ;;  %v1283_v7 = vpack.c.bf16 %v2105_v25, %v2104_v24 }
  0xc0   :  { %1228 = vmatpush3.bf16.msra.mxu0 %v1227_v29  ;;  %1268 = vmatpush3.bf16.msra.mxu1 %v1811_v41 }
  0xc1   :  { %1230 = vmatprep.subr.bf16.mxu0 %v1229_v23  ;;  %1270 = vmatprep.subr.bf16.mxu1 %v1813_v13 }
  0xc4   :  { %1232 = vmatpush3.bf16.msra.mxu0 %v2089_v59  ;;  %1272 = vmatpush3.bf16.msra.mxu1 %v1818_v60 }
  0xc5   :  { %1234 = vmatprep.subr.bf16.mxu0 %v2090_v18  ;;  %1306 = vmatprep.subr.bf16.mxu1 %v1499_v53  ;;  %v2095_v53 = vpack.c.bf16 %v1802_v45, %v1800_v42  ;;  %v2110_v42 = vand.u32 4294901760, %v2109_v8 }
  0xc7   :  { %642 = vmatmul.mubr.f32.vlgmr.msra.gmra.mrb[2].mxu1 %v161_v0 }
  0xc8   :  { %1236 = vmatpush3.bf16.msra.mxu0 %v2091_v36  ;;  %1308 = vmatpush3.bf16.msra.mxu1 %v1519_v63  ;;  %v2096_v63 = vand.u32 4294901760, %v1433_v20  ;;  %v2102_v20 = vand.u32 4294901760, %v1523_v4  ;;  %v2108_v4 = vand.u32 4294901760, %v1582_v44 }
  0xc9   :  { %912 = vmatprep.mubr.f32.mxu1 %v153_v3  ;;  %1238 = vmatprep.subr.bf16.mxu0 %v2092_v17 }
  0xca   :  { %1310 = vmatprep.subr.bf16.mxu1 %v1539_v10  ;;  %v1275_v38 = vpack.c.bf16 %v2097_v32, %v2096_v63  ;;  %v2100_v10 = vand.u32 4294901760, %v1448_v26  ;;  %v2106_v26 = vand.u32 4294901760, %v1554_v35  ;;  %v1287_v62 = vpack.c.bf16 %v2110_v42, %v2108_v4  ;;  %v2113_v35 = vld [vmem:[#allocation15_spill] sm:$0xff] }
  0xcc   :  { %1240 = vmatpush3.bf16.msra.mxu0 %v2095_v53  ;;  %1312 = vmatpush3.bf16.msra.mxu1 %v1558_v15  ;;  %v2101_v15 = vand.u32 4294901760, %v1454_v30  ;;  %v2107_v30 = vand.u32 4294901760, %v1564_v37 }
  0xcd   :  { %1274 = vmatprep.subr.bf16.mxu0 %v1273_v39  ;;  %1314 = vmatprep.subr.bf16.mxu1 %v1608_v61  ;;  %v1281_v61 = vpack.c.bf16 %v2103_v21, %v2102_v20 }
  0xce   :  { %v1279_v45 = vpack.c.bf16 %v2101_v15, %v2100_v10  ;;  %v1285_v54 = vpack.c.bf16 %v2107_v30, %v2106_v26 }
  0xcf   :  { %534 = vmatmul.mubr.f32.vlgmr.msra.gmra.mrb[2].mxu0 %v160_v27 }
  0xd0   :  { %1276 = vmatpush3.bf16.msra.mxu0 %v1275_v38  ;;  %808 = vmatprep.mubr.f32.mxu0 %v153_v3 }
  0xd1   :  { %1316 = vmatpush3.bf16.msra.mxu1 %v2080_v50  ;;  %1278 = vmatprep.subr.bf16.mxu0 %v1277_v58 }
  0xd2   :  { %1318 = vmatprep.subr.bf16.mxu1 %v2082_v55 }
  0xd4   :  { %1280 = vmatpush3.bf16.msra.mxu0 %v1279_v45 }
  0xd5   :  { %1320 = vmatpush3.bf16.msra.mxu1 %v2084_v57  ;;  %1282 = vmatprep.subr.bf16.mxu0 %v1281_v61 }
  0xd6   :  { %1322 = vmatprep.subr.bf16.mxu1 %v2085_v5 }
  0xd8   :  { %1284 = vmatpush3.bf16.msra.mxu0 %v1283_v7 }
  0xd9   :  { %1324 = vmatpush3.bf16.msra.mxu1 %v2086_v49  ;;  %1286 = vmatprep.subr.bf16.mxu0 %v1285_v54 }
  0xda   :  { %1326 = vmatprep.subr.bf16.mxu1 %v2087_v43 }
  0xdc   :  { %1288 = vmatpush3.bf16.msra.mxu0 %v1287_v62 }
  0xdd   :  { %1328 = vmatpush3.bf16.msra.mxu1 %v2088_v1  ;;  %1290 = vmatprep.subr.bf16.mxu0 %v1859_v28 }
  0xde   :  { %1330 = vmatprep.subr.bf16.mxu1 %v1805_v47 }
  0xe0   :  { %1292 = vmatpush3.bf16.msra.mxu0 %v1865_v22 }
  0xe1   :  { %1332 = vmatpush3.bf16.msra.mxu1 %v1811_v41  ;;  %1294 = vmatprep.subr.bf16.mxu0 %v2111_v9 }
  0xe2   :  { %1334 = vmatprep.subr.bf16.mxu1 %v1813_v13 }
  0xe4   :  { %1296 = vmatpush3.bf16.msra.mxu0 %v2112_v31 }
  0xe5   :  { %1336 = vmatpush3.bf16.msra.mxu1 %v1818_v60  ;;  %1298 = vmatprep.subr.bf16.mxu0 %v2113_v35 }
  0xe8   :  { %914 = vmatmul.mubr.f32.vlgmr.msra.gmra.mrb[4].mxu1 %v1897_v11  ;;  %1300 = vmatpush3.bf16.msra.mxu0 %v1889_v56 }
  0xe9   :  { %1302 = vmatprep.subr.bf16.mxu0 %v1891_v52 }
  0xec   :  { %1304 = vmatpush3.bf16.msra.mxu0 %v1893_v6 }
  0xef   :  { %810 = vmatmul.mubr.f32.vlgmr.msra.gmra.mrb[4].mxu0 %v1897_v11 }
 0x17a   :  { %v1002_v37 = vpop.f32.mrb[0].mxu1 }
 0x17b   :  { %v1003_v44 = vpop.f32.mrb[1].mxu1 }
 0x17c   :  { %v1004_v47 = vadd.f32 %v1003_v44, %v1002_v37 }
 0x182   :  { %v967_v41 = vpop.f32.mrb[0].mxu0 }
 0x183   :  { %v968_v13 = vpop.f32.mrb[1].mxu0 }
 0x184   :  { %v969_v28 = vadd.f32 %v968_v13, %v967_v41 }
 0x186   :  { %v398_v29 = vadd.f32 %v1004_v47, %v969_v28 }
 0x19a   :  { %v1072_v60 = vpop.f32.mrb[2].mxu1 }
 0x19b   :  { %v1073_v23 = vpop.f32.mrb[3].mxu1 }
 0x19c   :  { %v1074_v22 = vadd.f32 %v1073_v23, %v1072_v60 }
 0x1a2   :  { %v1037_v3 = vpop.f32.mrb[2].mxu0 }
 0x1a3   :  { %v1038_v27 = vpop.f32.mrb[3].mxu0 }
 0x1a4   :  { %v1039_v0 = vadd.f32 %v1038_v27, %v1037_v3 }
 0x1a6   :  { %v536_v56 = vadd.f32 %v1039_v0, %v398_v29 }
 0x1a8   :  { %v644_v46 = vadd.f32 %v1074_v22, %v536_v56 }
 0x1bb   :  { %v1142_v52 = vpop.f32.mrb[4].mxu1 }
 0x1bc   :  { %v1143_v48 = vpop.f32.mrb[5].mxu1 }
 0x1bd   :  { %v1144_v6 = vadd.f32 %v1143_v48, %v1142_v52 }
 0x1c2   :  { %v1107_v34 = vpop.f32.mrb[4].mxu0 }
 0x1c3   :  { %v1108_v11 = vpop.f32.mrb[5].mxu0 }
 0x1c4   :  { %v1109_v51 = vadd.f32 %v1108_v11, %v1107_v34 }
 0x1c6   :  { %v812_v33 = vadd.f32 %v1109_v51, %v644_v46 }
 0x1c8   :  { %v916_v50 = vadd.f32 %v1144_v6, %v812_v33 }
 0x1ca   :  { %920 = vst.msk [vmem:[#allocation2] sm:$0xff] %vm919_vm0, %v916_v50 }
 0x1cb   :  { %1353 = shalt.err (!%p1350_p4)
}
 0x1cc   :  { %s1354_s22 = scalar_lea.hbm %s2012_s2, 128 }
 0x1cd   :  { %p1355_p5 = scmp.ne.s32.totalorder %s2012_s2, %s1354_s22  ;;  %p1358_p6 = scmp.lt.u32.totalorder %s1354_s22, %s2012_s2 }
 0x1cf   :  { %p1360_p7 = pnand %p1358_p6, %p1355_p5 }
 0x1d1   :  { %1363 = shalt.err (!%p1360_p7)
}
 0x1d2   :  { %930 = dma.vmem_to_hbm [thread:$0]  %s928_s19, 128, %s2012_s2, [#allocation3]  }
 0x1d3   :  { %1364 = dma.done.wait [#allocation3], 128  }
 0x1d4   :  { %1365 = vsyncadd [#allocation3], 4294967168 }
 0x1d5   :  { %934 = vsyncpa [#allocation3], 1 }

</bundles_post_ra>
